<compile_context>
chip_gen: v5e
topology: v5e:2x2
jax: 0.10.0
libtpu: 0.0.40
codegen_flags: <defaults>
</compile_context>

<pallas_src>
import math

import jax
import jax.numpy as jnp
from jax.experimental import pallas as pl
from jax.experimental.pallas import tpu as pltpu

_EPS = 1e-6                               # LayerNormalisation default eps
_VMEM_LIMIT = 32 * 1024 * 1024            # explicit scoped-VMEM budget (safe v5e/v6e/v7x)
_TARGET_BLOCK_BYTES = 2 * 1024 * 1024     # ~2 MiB per operand per buffer


def _sublane_min(dtype) -> int:
    """Minimum dense row tile for the dtype packing (8 f32 / 16 bf16 / 32 int8)."""
    return {4: 8, 2: 16, 1: 32}.get(jnp.dtype(dtype).itemsize, 8)


def _pick_block_rows(n: int, d: int, dtype) -> int:
    """VMEM-budget-driven row tile, multiple of the dtype sublane tile."""
    sub = _sublane_min(dtype)
    bytes_per_row = max(d * jnp.dtype(dtype).itemsize, 1)
    tb = max(sub, (_TARGET_BLOCK_BYTES // bytes_per_row) // sub * sub)
    tb = min(tb, n)
    if tb >= sub:
        tb = (tb // sub) * sub            # ragged tail handled by pl.cdiv grid
    else:
        tb = n                            # tiny inputs: single full-extent block
    return int(tb)


def _compiler_params():
    return pltpu.CompilerParams(
        dimension_semantics=("parallel",),
        vmem_limit_bytes=_VMEM_LIMIT,
    )


# --------------------------- LayerNormalisation kernel ---------------------------
def _layernorm_kernel(x_ref, alpha_ref, bias_ref, o_ref):
    x = x_ref[...].astype(jnp.float32)
    d = x.shape[-1]
    mean = jnp.mean(x, axis=-1, keepdims=True)
    diff = x - mean
    # torch.std default: unbiased estimator (divide by d - 1)
    var = jnp.sum(diff * diff, axis=-1, keepdims=True) * (1.0 / (d - 1))
    inv = 1.0 / (jnp.sqrt(var) + _EPS)            # (TB, 1): one divide per row
    y = diff * (alpha_ref[0] * inv) + bias_ref[0]
    o_ref[...] = y.astype(o_ref.dtype)


def layer_norm_2d(x2d, alpha, bias, *, block_rows):
    n, d = x2d.shape
    return pl.pallas_call(
        _layernorm_kernel,
        out_shape=jax.ShapeDtypeStruct((n, d), x2d.dtype),
        grid_spec=pltpu.PrefetchScalarGridSpec(
            num_scalar_prefetch=0,
            grid=(pl.cdiv(n, block_rows),),
            in_specs=[
                pl.BlockSpec((block_rows, d), lambda i: (i, 0)),
                pl.BlockSpec(memory_space=pltpu.MemorySpace.SMEM),  # alpha (1,)
                pl.BlockSpec(memory_space=pltpu.MemorySpace.SMEM),  # bias  (1,)
            ],
            out_specs=pl.BlockSpec((block_rows, d), lambda i: (i, 0)),
        ),
        compiler_params=_compiler_params(),
    )(x2d, alpha, bias)


# ----------------------- residual (+ optional dropout) kernels -------------------
def _residual_add_kernel(x_ref, s_ref, o_ref):
    o_ref[...] = x_ref[...] + s_ref[...]


def residual_add_2d(x2d, s2d, *, block_rows):
    n, d = x2d.shape
    return pl.pallas_call(
        _residual_add_kernel,
        out_shape=jax.ShapeDtypeStruct((n, d), x2d.dtype),
        grid_spec=pltpu.PrefetchScalarGridSpec(
            num_scalar_prefetch=0,
            grid=(pl.cdiv(n, block_rows),),
            in_specs=[
                pl.BlockSpec((block_rows, d), lambda i: (i, 0)),
                pl.BlockSpec((block_rows, d), lambda i: (i, 0)),
            ],
            out_specs=pl.BlockSpec((block_rows, d), lambda i: (i, 0)),
        ),
        input_output_aliases={1: 0},      # reuse dead sublayer-output buffer
        compiler_params=_compiler_params(),
    )(x2d, s2d)


def _make_residual_dropout_kernel(drop_p: float, block_rows: int, d: int):
    # keep  <=>  hash(bits) >= drop_p * 2^32   (pure integer compare per element)
    threshold = min(int(round(drop_p * float(1 << 32))), (1 << 32) - 1)
    inv_keep = 1.0 / (1.0 - drop_p)

    def kernel(seed_ref, x_ref, s_ref, o_ref):
        # Portable counter-based PRNG: murmur3 finalizer over the global element
        # index mixed with the seed.  Only standard jnp integer ops (VPU), so it
        # lowers on TPU and in interpret mode alike.
        row = jax.lax.broadcasted_iota(jnp.uint32, (block_rows, d), 0)
        col = jax.lax.broadcasted_iota(jnp.uint32, (block_rows, d), 1)
        blk = pl.program_id(0).astype(jnp.uint32)
        gidx = (blk * jnp.uint32(block_rows) + row) * jnp.uint32(d) + col
        h = gidx ^ (seed_ref[0].astype(jnp.uint32) * jnp.uint32(0x9E3779B9))
        h = h ^ (h >> jnp.uint32(16))
        h = h * jnp.uint32(0x85EBCA6B)
        h = h ^ (h >> jnp.uint32(13))
        h = h * jnp.uint32(0xC2B2AE35)
        h = h ^ (h >> jnp.uint32(16))
        keep = h >= jnp.uint32(threshold)

        s = s_ref[...]
        scaled = s * jnp.asarray(inv_keep, dtype=s.dtype)   # stay in native dtype
        o_ref[...] = x_ref[...] + jnp.where(keep, scaled, jnp.zeros_like(scaled))

    return kernel


def residual_dropout_2d(x2d, s2d, seed, drop_p, *, block_rows):
    n, d = x2d.shape
    seed_arr = jnp.asarray([seed], dtype=jnp.int32)
    return pl.pallas_call(
        _make_residual_dropout_kernel(float(drop_p), block_rows, d),
        out_shape=jax.ShapeDtypeStruct((n, d), x2d.dtype),
        grid_spec=pltpu.PrefetchScalarGridSpec(
            num_scalar_prefetch=0,
            grid=(pl.cdiv(n, block_rows),),
            in_specs=[
                pl.BlockSpec(memory_space=pltpu.MemorySpace.SMEM),  # seed (1,)
                pl.BlockSpec((block_rows, d), lambda i: (i, 0)),
                pl.BlockSpec((block_rows, d), lambda i: (i, 0)),
            ],
            out_specs=pl.BlockSpec((block_rows, d), lambda i: (i, 0)),
        ),
        input_output_aliases={2: 0},      # reuse dead sublayer-output buffer
        compiler_params=_compiler_params(),
    )(seed_arr, x2d, s2d)


# ------------------------------ module forward ------------------------------------
def residual_connection(x, sublayer, alpha, bias, *, dropout_p=0.0,
                        training=False, seed=0):
    """Pallas equivalent of ResidualConnection.forward: x + dropout(sublayer(norm(x)))."""
    orig_shape = x.shape
    d = orig_shape[-1]
    n = int(math.prod(orig_shape[:-1]))
    tb = _pick_block_rows(n, d, x.dtype)

    x2d = x.reshape(n, d)
    y2d = layer_norm_2d(x2d, alpha, bias, block_rows=tb)
    # The sublayer is an arbitrary callable; it runs as plain JAX between kernels.
    s2d = sublayer(y2d.reshape(orig_shape)).reshape(n, d)

    if training and dropout_p > 0.0:
        out2d = residual_dropout_2d(x2d, s2d, seed, float(dropout_p), block_rows=tb)
    else:
        out2d = residual_add_2d(x2d, s2d, block_rows=tb)
    return out2d.reshape(orig_shape)


if __name__ == "__main__":
    batch, seq, d_model = 2, 8, 128
    dropout_p = 0.1

    key = jax.random.PRNGKey(0)
    kx, kw = jax.random.split(key)
    x = jax.random.normal(kx, (batch, seq, d_model), dtype=jnp.float32)
    w = jax.random.normal(kw, (d_model, d_model), dtype=jnp.float32) / math.sqrt(d_model)

    # LayerNormalisation params (module inits both to ones(1); distinct values here
    # so the alpha/bias wiring is actually exercised by the check).
    alpha = jnp.full((1,), 1.25, dtype=jnp.float32)
    bias = jnp.full((1,), -0.5, dtype=jnp.float32)

    def sublayer(y):
        return jnp.tanh(y @ w)

    # --- eval mode (dropout is identity): exact check vs pure-JAX reference ---
    out_eval = residual_connection(x, sublayer, alpha, bias,
                                   dropout_p=dropout_p, training=False)
    out_eval = jax.block_until_ready(out_eval)

    def layernorm_ref(v):
        mean = jnp.mean(v, axis=-1, keepdims=True)
        std = jnp.std(v, axis=-1, keepdims=True, ddof=1)  # torch.std is unbiased
        return alpha * (v - mean) / (std + _EPS) + bias

    ref = x + sublayer(layernorm_ref(x))
    assert out_eval.shape == (batch, seq, d_model)
    assert jnp.allclose(out_eval, ref, atol=1e-4, rtol=1e-4), float(
        jnp.max(jnp.abs(out_eval - ref)))

    # --- training mode: exercise the in-kernel dropout path ---
    out_train = residual_connection(x, sublayer, alpha, bias,
                                    dropout_p=dropout_p, training=True, seed=1234)
    out_train = jax.block_until_ready(out_train)
    assert out_train.shape == (batch, seq, d_model)
    assert bool(jnp.all(jnp.isfinite(out_train)))
    # Dropped positions keep only the residual (out == x); fraction ~= dropout_p.
    dropped_frac = float(jnp.mean(jnp.isclose(out_train, x, atol=1e-7)))
    assert abs(dropped_frac - dropout_p) < 0.08, dropped_frac

    print("KERNEL_OK")
</pallas_src>

<mosaic_0001>
module attributes {stable_mosaic.version = 11 : i64} {
  func.func @_layernorm_kernel(%arg0: i32, %arg1: memref<16x128xf32, #tpu.memory_space<vmem>>, %arg2: memref<1xf32, #tpu.memory_space<smem>>, %arg3: memref<1xf32, #tpu.memory_space<smem>>, %arg4: memref<16x128xf32, #tpu.memory_space<vmem>>) attributes {dimension_semantics = [#tpu.dimension_semantics<parallel>], iteration_bounds = array<i64: 1>, scalar_prefetch = 0 : i64, scratch_operands = 0 : i64, tpu.core_type = #tpu.core_type<tc>, window_params = [{transform_indices = @transform_0, window_bounds = array<i64: 16, 128>}, {transform_indices = @transform_1, window_bounds = array<i64: 1>}, {transform_indices = @transform_2, window_bounds = array<i64: 1>}, {transform_indices = @transform_3, window_bounds = array<i64: 16, 128>}]} {
    %c0 = arith.constant 0 : index
    %c0_0 = arith.constant 0 : index
    %0 = vector.load %arg1[%c0, %c0_0] : memref<16x128xf32, #tpu.memory_space<vmem>>, vector<16x128xf32>
    %cst = arith.constant dense<0.000000e+00> : vector<16xf32>
    %1 = vector.multi_reduction <add>, %0, %cst [1] : vector<16x128xf32> to vector<16xf32>
    %2 = vector.shape_cast %1 : vector<16xf32> to vector<16x1xf32>
    %cst_1 = arith.constant 1.280000e+02 : f32
    %3 = vector.broadcast %cst_1 : f32 to vector<16x1xf32>
    %4 = arith.divf %2, %3 : vector<16x1xf32>
    %5 = vector.broadcast %4 : vector<16x1xf32> to vector<16x128xf32>
    %6 = arith.subf %0, %5 : vector<16x128xf32>
    %7 = arith.mulf %6, %6 : vector<16x128xf32>
    %cst_2 = arith.constant dense<0.000000e+00> : vector<16xf32>
    %8 = vector.multi_reduction <add>, %7, %cst_2 [1] : vector<16x128xf32> to vector<16xf32>
    %9 = vector.shape_cast %8 : vector<16xf32> to vector<16x1xf32>
    %cst_3 = arith.constant 0.00787401571 : f32
    %10 = vector.broadcast %cst_3 : f32 to vector<16x1xf32>
    %11 = arith.mulf %9, %10 : vector<16x1xf32>
    %12 = math.sqrt %11 : vector<16x1xf32>
    %cst_4 = arith.constant 9.99999997E-7 : f32
    %13 = vector.broadcast %cst_4 : f32 to vector<16x1xf32>
    %14 = arith.addf %12, %13 : vector<16x1xf32>
    %cst_5 = arith.constant 1.000000e+00 : f32
    %15 = vector.broadcast %cst_5 : f32 to vector<16x1xf32>
    %16 = arith.divf %15, %14 : vector<16x1xf32>
    %c0_6 = arith.constant 0 : index
    %17 = memref.load %arg2[%c0_6] : memref<1xf32, #tpu.memory_space<smem>>
    %18 = vector.broadcast %17 : f32 to vector<16x1xf32>
    %19 = arith.mulf %18, %16 : vector<16x1xf32>
    %20 = vector.broadcast %19 : vector<16x1xf32> to vector<16x128xf32>
    %21 = arith.mulf %6, %20 : vector<16x128xf32>
    %c0_7 = arith.constant 0 : index
    %22 = memref.load %arg3[%c0_7] : memref<1xf32, #tpu.memory_space<smem>>
    %23 = vector.broadcast %22 : f32 to vector<16x128xf32>
    %24 = arith.addf %21, %23 : vector<16x128xf32>
    %c0_8 = arith.constant 0 : index
    %c0_9 = arith.constant 0 : index
    %25 = vector.load %arg4[%c0_8, %c0_9] : memref<16x128xf32, #tpu.memory_space<vmem>>, vector<16x128xf32>
    tpu.vector_store %arg4[%c0_8, %c0_9], %24 {strides = array<i32>} : memref<16x128xf32, #tpu.memory_space<vmem>>, vector<16x128xf32>,
    return
  }
  func.func @transform_0(%arg0: i32) -> (i32, i32) {
    %c0_i32 = arith.constant 0 : i32
    %c0_i32_0 = arith.constant 0 : i32
    return %arg0, %c0_i32 : i32, i32
  }
  func.func @transform_1(%arg0: i32) -> i32 {
    %c0_i32 = arith.constant 0 : i32
    %c0_i32_0 = arith.constant 0 : i32
    return %c0_i32 : i32
  }
  func.func @transform_2(%arg0: i32) -> i32 {
    %c0_i32 = arith.constant 0 : i32
    %c0_i32_0 = arith.constant 0 : i32
    return %c0_i32 : i32
  }
  func.func @transform_3(%arg0: i32) -> (i32, i32) {
    %c0_i32 = arith.constant 0 : i32
    %c0_i32_0 = arith.constant 0 : i32
    return %arg0, %c0_i32 : i32, i32
  }
}

</mosaic_0001>

<bundles_post_ra>
// kernel: tpu_custom_call.1
= control target key start
LH: loop header
LB: loop body
LE: loop exit
PB: predicated region body
PF: predicated region fallthrough
CT: control target
= control target key end

     0   :  { %10 = vsyncpa [#allocation5], 0  ;;  %s265_s0 = inlined_call_operand.hbm [shape: f32[16,128], index: 0, kind: input, shape index: {}]   ;;  %s266_s1 = inlined_call_operand.<no memory space> [shape: f32[1], index: 1, kind: input, shape index: {}]   ;;  %s267_s2 = inlined_call_operand.<no memory space> [shape: f32[1], index: 2, kind: input, shape index: {}]   ;;  %s268_s3 = inlined_call_operand.hbm [shape: f32[16,128], index: 3, kind: output, shape index: {}]  }
   0x1   :  { %11 = vsyncpa [#allocation6], 0  ;;  %s16_s14 = sshll.u32 %s265_s0, 4  ;;  %s212_s15 = smov [#allocation4]   ;;  %s17_s14 = int_to_ptr.hbm [resolvable:$true] %s16_s14 }
   0x2   :  { %s18_s16 = sshll.u32 %s212_s15, 4  ;;  %s213_s17 = smov 128   ;;  %s19_s16 = int_to_ptr.vmem [resolvable:$true] %s18_s16 }
   0x3   :  { %s214_s18 = smov 8  }
   0x4   :  { %24 = dma.hbm_to_vmem [thread:$0]  %s17_s14, 256, %s19_s16, [#allocation5], %s213_s17, %s213_s17, %s214_s18  }
   0x5   :  { %208 = dma.done.wait [#allocation5], 256  }
   0x6   :  { %209 = vsyncadd [#allocation5], 4294967040  ;;  %v33_v0 = vld [vmem:[#allocation4] sm:$0xff]  ;;  %v34_v1 = vld [vmem:[#allocation4 + $0x8] sm:$0xff]  ;;  %v215_v2 = vmov 128.0   ;;  %v115_v52 = vstv %s266_s1  ;;  %v121_v59 = vstv %s267_s2  ;;  %s216_s1 = smov [#allocation7]  }
   0x7   :  { %35 = vadd.xlane.f32.xlu0 %v33_v0  ;;  %150 = vrcp.f32 %v215_v2  ;;  %s130_s22 = sshll.u32 %s216_s1, 4  ;;  %s132_s2 = sshll.u32 %s268_s3, 4  ;;  %s131_s22 = int_to_ptr.vmem [resolvable:$true] %s130_s22  ;;  %s133_s2 = int_to_ptr.hbm [resolvable:$true] %s132_s2 }
   0xd   :  { %v151_v3 = vpop.eup %150 }
   0xe   :  { %v40_v4 = vmul.f32 128.0, %v151_v3  ;;  %vm44_vm0 = vweird.f32 %v151_v3 }
   0xf   :  { %37 = vadd.xlane.f32.xlu0 %v34_v1 }
  0x10   :  { %v41_v5 = vsub.f32 1.0, %v40_v4 }
  0x12   :  { %v42_v6 = vmul.f32 %v151_v3, %v41_v5 }
  0x14   :  { %v43_v7 = vadd.f32 %v151_v3, %v42_v6 }
  0x16   :  { %v45_v8 = vsel %vm44_vm0, %v151_v3, %v43_v7 }
  0x7a   :  { %v36_v9 = vpop.xlane.xlu0 %35 }
  0x7b   :  { %v46_v10 = vmul.f32 %v45_v8, %v36_v9 }
  0x7d   :  { %v243_v11 = vsub.f32 %v33_v0, %v46_v10 }
  0x7f   :  { %v50_v12 = vmul.f32 %v243_v11, %v243_v11 }
  0x81   :  { %52 = vadd.xlane.f32.xlu1 %v50_v12 }
  0x82   :  { %v38_v13 = vpop.xlane.xlu0 %37 }
  0x83   :  { %v47_v14 = vmul.f32 %v45_v8, %v38_v13 }
  0x85   :  { %v247_v15 = vsub.f32 %v34_v1, %v47_v14 }
  0x87   :  { %v51_v16 = vmul.f32 %v247_v15, %v247_v15 }
  0x89   :  { %54 = vadd.xlane.f32.xlu1 %v51_v16 }
  0xf4   :  { %v53_v17 = vpop.xlane.xlu1 %52 }
  0xf5   :  { %v56_v18 = vmul.f32 0.007874016, %v53_v17 }
  0xf7   :  { %152 = vrsqrt.f32 %v56_v18  ;;  %vm65_vm1 = vcmp.eq.f32.partialorder %v56_v18, inf  ;;  %v68_v31 = vand.u32 2147483648, %v56_v18  ;;  %vm67_vm2 = vcmp.eq.f32.partialorder %v56_v18, 0.0 }
  0xfc   :  { %v55_v19 = vpop.xlane.xlu1 %54 }
  0xfd   :  { %v153_v20 = vpop.eup %152  ;;  %v57_v21 = vmul.f32 0.007874016, %v55_v19 }
  0xfe   :  { %v59_v22 = vmul.f32 %v153_v20, %v56_v18 }
  0xff   :  { %154 = vrsqrt.f32 %v57_v21  ;;  %vm77_vm3 = vcmp.eq.f32.partialorder %v57_v21, inf  ;;  %v80_v39 = vand.u32 2147483648, %v57_v21  ;;  %vm79_vm4 = vcmp.eq.f32.partialorder %v57_v21, 0.0 }
 0x100   :  { %v60_v23 = vmul.f32 %v153_v20, %v59_v22 }
 0x102   :  { %v61_v24 = vmul.f32 0.5, %v60_v23 }
 0x104   :  { %v62_v25 = vsub.f32 1.5, %v61_v24 }
 0x105   :  { %v155_v26 = vpop.eup %154 }
 0x106   :  { %v63_v27 = vmul.f32 %v153_v20, %v62_v25  ;;  %v71_v28 = vmul.f32 %v155_v26, %v57_v21 }
 0x108   :  { %v64_v29 = vmul.f32 %v63_v27, %v56_v18  ;;  %v72_v30 = vmul.f32 %v155_v26, %v71_v28 }
 0x10a   :  { %v66_v32 = vsel %vm65_vm1, %v56_v18, %v64_v29  ;;  %v73_v33 = vmul.f32 0.5, %v72_v30 }
 0x10b   :  { %v69_v34 = vsel %vm67_vm2, %v68_v31, %v66_v32 }
 0x10c   :  { %v82_v35 = vadd.f32 1e-06, %v69_v34  ;;  %v74_v36 = vsub.f32 1.5, %v73_v33 }
 0x10e   :  { %156 = vrcp.f32 %v82_v35  ;;  %v75_v37 = vmul.f32 %v155_v26, %v74_v36  ;;  %v95_v46 = vand.u32 2147483648, %v82_v35  ;;  %v93_v48 = vand.u32 2147483647, %v82_v35 }
 0x10f   :  { %vm89_vm6 = vweird.f32 %v82_v35 }
 0x110   :  { %v76_v38 = vmul.f32 %v75_v37, %v57_v21  ;;  %v96_v51 = vor.u32 1.1754944e-38, %v95_v46  ;;  %vm94_vm8 = vcmp.eq.f32.partialorder %v93_v48, 8.507059e+37 }
 0x112   :  { %v78_v40 = vsel %vm77_vm3, %v57_v21, %v76_v38 }
 0x113   :  { %v81_v41 = vsel %vm79_vm4, %v80_v39, %v78_v40 }
 0x114   :  { %v157_v42 = vpop.eup %156  ;;  %v83_v43 = vadd.f32 1e-06, %v81_v41 }
 0x115   :  { %v85_v44 = vmul.f32 %v157_v42, %v82_v35  ;;  %vm90_vm5 = vweird.f32 %v157_v42 }
 0x116   :  { %158 = vrcp.f32 %v83_v43  ;;  %vm91_vm7 = vmor %vm89_vm6, %vm90_vm5  ;;  %v110_v58 = vand.u32 2147483648, %v83_v43  ;;  %v108_v61 = vand.u32 2147483647, %v83_v43  ;;  %vm104_vm10 = vweird.f32 %v83_v43 }
 0x117   :  { %v86_v45 = vsub.f32 1.0, %v85_v44 }
 0x118   :  { %v111_v1 = vor.u32 1.1754944e-38, %v110_v58  ;;  %vm109_vm12 = vcmp.eq.f32.partialorder %v108_v61, 8.507059e+37 }
 0x119   :  { %v87_v47 = vmul.f32 %v157_v42, %v86_v45 }
 0x11b   :  { %v88_v49 = vadd.f32 %v157_v42, %v87_v47 }
 0x11c   :  { %v159_v50 = vpop.eup %158 }
 0x11d   :  { %v92_v53 = vsel %vm91_vm7, %v157_v42, %v88_v49  ;;  %v100_v54 = vmul.f32 %v159_v50, %v83_v43  ;;  %vm105_vm9 = vweird.f32 %v159_v50 }
 0x11e   :  { %v97_v55 = vsel %vm94_vm8, %v96_v51, %v92_v53  ;;  %vm106_vm11 = vmor %vm104_vm10, %vm105_vm9 }
 0x11f   :  { %v101_v56 = vsub.f32 1.0, %v100_v54  ;;  %v116_v57 = vmul.f32 %v115_v52, %v97_v55 }
 0x121   :  { %v102_v60 = vmul.f32 %v159_v50, %v101_v56  ;;  %v118_v62 = vmul.f32 %v116_v57, %v243_v11 }
 0x123   :  { %v103_v63 = vadd.f32 %v159_v50, %v102_v60  ;;  %v122_v0 = vadd.f32 %v121_v59, %v118_v62 }
 0x125   :  { %v107_v2 = vsel %vm106_vm11, %v159_v50, %v103_v63  ;;  %124 = vst [vmem:[#allocation7] sm:$0xff] %v122_v0 }
 0x126   :  { %v112_v3 = vsel %vm109_vm12, %v111_v1, %v107_v2 }
 0x127   :  { %v117_v4 = vmul.f32 %v115_v52, %v112_v3 }
 0x129   :  { %v119_v5 = vmul.f32 %v117_v4, %v247_v15 }
 0x12b   :  { %v123_v6 = vadd.f32 %v121_v59, %v119_v5 }
 0x12d   :  { %125 = vst [vmem:[#allocation7 + $0x8] sm:$0xff] %v123_v6 }
 0x12e   :  { %138 = dma.vmem_to_hbm [thread:$0]  %s131_s22, 256, %s133_s2, [#allocation6], %s213_s17, %s213_s17, %s214_s18  }
 0x12f   :  { %210 = dma.done.wait [#allocation6], 256  }
 0x130   :  { %211 = vsyncadd [#allocation6], 4294967040 }
 0x131   :  { %143 = vsyncpa [#allocation5], 1 }
 0x132   :  { %144 = vsyncpa [#allocation6], 1 }

</bundles_post_ra>
